<compile_context>
chip_gen: v7x
topology: tpu7x:2x2x1
jax: 0.10.0
libtpu: 0.0.40
codegen_flags: <defaults>
</compile_context>

<pallas_src>
import functools

import jax
import jax.numpy as jnp
from jax.experimental import pallas as pl
from jax.experimental.pallas import tpu as pltpu


def _layernorm_kernel(x_ref, ab_ref, o_ref, *, eps, features):
    x = x_ref[...].astype(jnp.float32)                        # [tile_rows, F]

    inv_n = 1.0 / features                                    # strength-reduced
    inv_nm1 = 1.0 / (features - 1)                            # unbiased (torch)

    # Two-pass mean/var (robust to large-mean inputs); 'centered' is reused
    # for the output so only ~2 full f32 tiles are ever live.
    mean = jnp.sum(x, axis=-1, keepdims=True) * inv_n
    centered = x - mean
    var = jnp.sum(centered * centered, axis=-1, keepdims=True) * inv_nm1
    std = jnp.sqrt(var)                                        # EUP
    inv = 1.0 / (std + eps)                                    # exact: [tile, 1]

    ab = ab_ref[...].astype(jnp.float32)                       # [2, F]
    a = ab[0:1, :]
    b = ab[1:2, :]

    o_ref[...] = (centered * (a * inv) + b).astype(o_ref.dtype)


def _vmem_capacity_bytes():
    """Per-TensorCore VMEM: 128 MiB on v5e/v6e, 64 MiB on v7x."""
    kind = ""
    try:
        kind = jax.devices()[0].device_kind.lower()
    except Exception:
        pass
    is_v7 = "7" in kind
    per_tc_default = (64 if is_v7 else 128) * 1024 * 1024
    try:
        reported = int(pltpu.get_tpu_info().vmem_capacity_bytes)
        # On v7x the reported figure may be per-chip (2 TCs); clamp to per-TC.
        return max(min(reported, per_tc_default), 16 * 1024 * 1024)
    except Exception:
        # Per-generation fallback; if we couldn't even read device_kind, be
        # conservative (64 MiB works on every generation).
        return per_tc_default if kind else 64 * 1024 * 1024


def _choose_tile_rows(rows, features, itemsize, vmem_cap):
    # Per-row bytes across the pipeline: in + out tiles, each double-buffered,
    # in storage dtype, plus ~2 f32 working copies live in the kernel body.
    bytes_per_row = features * (4 * itemsize + 2 * 4)
    budget = int(vmem_cap * 0.5)                 # headroom for the compiler
    tile = budget // max(bytes_per_row, 1)
    tile = min(tile, 1024)                       # diminishing returns past ~1K rows
    # Keep the grid >= ~8 steps so the double-buffered pipeline actually
    # overlaps (and v7x's 2nd TC has blocks to take).
    tile = min(tile, pl.cdiv(rows, 8))
    rows_rounded = -(-rows // 8) * 8             # never allocate more than needed
    tile = min(tile, rows_rounded)
    if tile >= 16:
        tile = (tile // 16) * 16                 # bf16 sublane packing friendly
    else:
        tile = 8
    return max(tile, 8)


def layer_norm(x, a_2, b_2, eps=1e-6, tile_rows=None):
    """x: arbitrary-rank array; normalization over the last axis."""
    orig_shape = x.shape
    features = orig_shape[-1]
    assert features > 1, "unbiased std needs at least 2 features (torch gives nan)"

    rows = 1
    for d in orig_shape[:-1]:
        rows *= d
    x2 = x.reshape(rows, features)

    itemsize = jnp.dtype(x.dtype).itemsize
    vmem_cap = _vmem_capacity_bytes()
    if tile_rows is None:
        tile_rows = _choose_tile_rows(rows, features, itemsize, vmem_cap)

    # Fused scale/shift params: one [2, F] block, constant index map.
    ab = jnp.stack([a_2.reshape(features), b_2.reshape(features)], axis=0)

    # Scoped-VMEM limit sized to the actual footprint (with headroom), capped
    # below per-TensorCore physical capacity.
    footprint = tile_rows * features * (4 * itemsize + 2 * 4) + 4 * features * 4
    vmem_limit = min(int(vmem_cap * 0.9), max(2 * footprint, 32 * 1024 * 1024))

    # TODO(synk): for features < 128 a lane-dense layout (folding 128//F rows
    # into the lane axis with segmented reductions) would turn the masked
    # partial vst into an unmasked one; not done here since typical hidden
    # sizes are already multiples of 128.
    grid = (pl.cdiv(rows, tile_rows),)   # partial tail block handled by Pallas

    kernel = functools.partial(_layernorm_kernel, eps=eps, features=features)

    out = pl.pallas_call(
        kernel,
        out_shape=jax.ShapeDtypeStruct((rows, features), x.dtype),
        grid_spec=pltpu.PrefetchScalarGridSpec(
            num_scalar_prefetch=0,
            grid=grid,
            in_specs=[
                pl.BlockSpec((tile_rows, features), lambda i: (i, 0)),
                pl.BlockSpec((2, features), lambda i: (0, 0)),
            ],
            out_specs=pl.BlockSpec((tile_rows, features), lambda i: (i, 0)),
        ),
        compiler_params=pltpu.CompilerParams(
            dimension_semantics=("parallel",),
            vmem_limit_bytes=vmem_limit,
        ),
    )(x2, ab)

    return out.reshape(orig_shape)


def layer_norm_ref(x, a_2, b_2, eps=1e-6):
    """Pure-JAX reference matching torch semantics (unbiased std, eps on std)."""
    x32 = x.astype(jnp.float32)
    mean = jnp.mean(x32, axis=-1, keepdims=True)
    std = jnp.std(x32, axis=-1, keepdims=True, ddof=1)
    return (a_2 * (x32 - mean) / (std + eps) + b_2).astype(x.dtype)


if __name__ == "__main__":
    key = jax.random.PRNGKey(0)
    batch, seq, hidden = 2, 8, 32

    x = jax.random.normal(key, (batch, seq, hidden), dtype=jnp.float32)

    # deterministic parameter init (matches nn.Parameter(torch.ones/zeros))
    a_2 = jnp.ones((hidden,), dtype=jnp.float32)
    b_2 = jnp.zeros((hidden,), dtype=jnp.float32)

    out = layer_norm(x, a_2, b_2, eps=1e-6)
    out = jax.block_until_ready(out)

    ref = layer_norm_ref(x, a_2, b_2, eps=1e-6)
    assert out.shape == x.shape
    assert jnp.allclose(out, ref, atol=1e-5, rtol=1e-5), (
        float(jnp.max(jnp.abs(out - ref))))

    print("KERNEL_OK")
</pallas_src>

<mosaic_0001>
module attributes {stable_mosaic.version = 11 : i64} {
  func.func @_layernorm_kernel(%arg0: i32, %arg1: memref<8x32xf32, #tpu.memory_space<vmem>>, %arg2: memref<2x32xf32, #tpu.memory_space<vmem>>, %arg3: memref<8x32xf32, #tpu.memory_space<vmem>>) attributes {dimension_semantics = [#tpu.dimension_semantics<parallel>], iteration_bounds = array<i64: 2>, scalar_prefetch = 0 : i64, scratch_operands = 0 : i64, tpu.core_type = #tpu.core_type<tc>, window_params = [{transform_indices = @transform_0, window_bounds = array<i64: 8, 32>}, {pipeline_mode = #tpu.pipeline_mode<synchronous>, transform_indices = @transform_1, window_bounds = array<i64: 2, 32>}, {transform_indices = @transform_2, window_bounds = array<i64: 8, 32>}]} {
    %c0 = arith.constant 0 : index
    %c0_0 = arith.constant 0 : index
    %0 = vector.load %arg1[%c0, %c0_0] : memref<8x32xf32, #tpu.memory_space<vmem>>, vector<8x32xf32>
    %cst = arith.constant dense<0.000000e+00> : vector<8xf32>
    %1 = vector.multi_reduction <add>, %0, %cst [1] : vector<8x32xf32> to vector<8xf32>
    %2 = vector.shape_cast %1 : vector<8xf32> to vector<8x1xf32>
    %cst_1 = arith.constant 3.125000e-02 : f32
    %3 = vector.broadcast %cst_1 : f32 to vector<8x1xf32>
    %4 = arith.mulf %2, %3 : vector<8x1xf32>
    %5 = vector.broadcast %4 : vector<8x1xf32> to vector<8x32xf32>
    %6 = arith.subf %0, %5 : vector<8x32xf32>
    %7 = arith.mulf %6, %6 : vector<8x32xf32>
    %cst_2 = arith.constant dense<0.000000e+00> : vector<8xf32>
    %8 = vector.multi_reduction <add>, %7, %cst_2 [1] : vector<8x32xf32> to vector<8xf32>
    %9 = vector.shape_cast %8 : vector<8xf32> to vector<8x1xf32>
    %cst_3 = arith.constant 0.0322580636 : f32
    %10 = vector.broadcast %cst_3 : f32 to vector<8x1xf32>
    %11 = arith.mulf %9, %10 : vector<8x1xf32>
    %12 = math.sqrt %11 : vector<8x1xf32>
    %cst_4 = arith.constant 9.99999997E-7 : f32
    %13 = vector.broadcast %cst_4 : f32 to vector<8x1xf32>
    %14 = arith.addf %12, %13 : vector<8x1xf32>
    %cst_5 = arith.constant 1.000000e+00 : f32
    %15 = vector.broadcast %cst_5 : f32 to vector<8x1xf32>
    %16 = arith.divf %15, %14 : vector<8x1xf32>
    %c0_6 = arith.constant 0 : index
    %c0_7 = arith.constant 0 : index
    %17 = vector.load %arg2[%c0_6, %c0_7] : memref<2x32xf32, #tpu.memory_space<vmem>>, vector<2x32xf32>
    %18 = vector.extract_strided_slice %17 {offsets = [0, 0], sizes = [1, 32], strides = [1, 1]} : vector<2x32xf32> to vector<1x32xf32>
    %19 = vector.extract_strided_slice %17 {offsets = [1, 0], sizes = [1, 32], strides = [1, 1]} : vector<2x32xf32> to vector<1x32xf32>
    %20 = vector.broadcast %18 : vector<1x32xf32> to vector<8x32xf32>
    %21 = vector.broadcast %16 : vector<8x1xf32> to vector<8x32xf32>
    %22 = arith.mulf %20, %21 : vector<8x32xf32>
    %23 = arith.mulf %6, %22 : vector<8x32xf32>
    %24 = vector.broadcast %19 : vector<1x32xf32> to vector<8x32xf32>
    %25 = arith.addf %23, %24 : vector<8x32xf32>
    %c0_8 = arith.constant 0 : index
    %c0_9 = arith.constant 0 : index
    %26 = vector.load %arg3[%c0_8, %c0_9] : memref<8x32xf32, #tpu.memory_space<vmem>>, vector<8x32xf32>
    tpu.vector_store %arg3[%c0_8, %c0_9], %25 {strides = array<i32>} : memref<8x32xf32, #tpu.memory_space<vmem>>, vector<8x32xf32>,
    return
  }
  func.func @transform_0(%arg0: i32) -> (i32, i32) {
    %c0_i32 = arith.constant 0 : i32
    %c0_i32_0 = arith.constant 0 : i32
    return %arg0, %c0_i32 : i32, i32
  }
  func.func @transform_1(%arg0: i32) -> (i32, i32) {
    %c0_i32 = arith.constant 0 : i32
    %c0_i32_0 = arith.constant 0 : i32
    %c0_i32_1 = arith.constant 0 : i32
    return %c0_i32, %c0_i32_0 : i32, i32
  }
  func.func @transform_2(%arg0: i32) -> (i32, i32) {
    %c0_i32 = arith.constant 0 : i32
    %c0_i32_0 = arith.constant 0 : i32
    return %arg0, %c0_i32 : i32, i32
  }
}

</mosaic_0001>

<bundles_post_ra>
// kernel: tpu_custom_call.1
= control target key start
LH: loop header
LB: loop body
LE: loop exit
PB: predicated region body
PF: predicated region fallthrough
CT: control target
= control target key end

     0   :  { %7 = vsyncpa [#allocation3], 0  ;;  %s626_s0 = inlined_call_operand.hbm [shape: f32[16,32], index: 0, kind: input, shape index: {}]   ;;  %s627_s1 = inlined_call_operand.vmem [shape: f32[2,32], index: 1, kind: input, shape index: {}]   ;;  %s628_s2 = inlined_call_operand.hbm [shape: f32[16,32], index: 2, kind: output, shape index: {}]  }
   0x1   :  { %9 = vsyncpa [#allocation3 + $0x1], 0 }
   0x2   :  { %10 = vsyncpa [#allocation4], 0 }
   0x3   :  { %12 = vsyncpa [#allocation4 + $0x1], 0  ;;  %s455_s9 = smov 0   ;;  %s457_s10 = smov 0  }
   0x4   :  { %s459_s11 = smov 0   ;;  %s461_s12 = smov 0  }
   0x5 LB: > { %s476_s13 = sadd.s32 4294967295, %s436_s12   ;;  %s278_s14 = sadd.s32 4294967294, %s436_s12   ;;  %s436_s12 = sphi %s461_s12, %s643_s12   ;;  %s432_s11 = sphi %s459_s11, %s642_s11   ;;  %s428_s10 = sphi %s457_s10, %s641_s10   ;;  %s424_s9 = sphi %s455_s9, %s640_s9  }
   0x6   : > { %s480_s15 = sadd.s32 1, %s436_s12   ;;  %s25_s16 = sadd.s32 1, %s432_s11 }
   0x7   : > { %s22_s17 = ssub.s32 %s436_s12, %s480_s15  ;;  %p32_p0 = scmp.ne.s32.totalorder %s432_s11, %s428_s10 }
   0x8   : > { %p23_p1 = scmp.eq.s32.totalorder %s22_s17, 0  ;;  %p33_p2 = scmp.eq.s32.totalorder %s436_s12, 0 }
   0x9   : > { %p38_p3 = scmp.ne.s32.totalorder %s428_s10, %s424_s9  ;;  %p39_p4 = scmp.eq.s32.totalorder %s476_s13, 0 }
   0xa   : > { %s492_s18 = scalar_select %p23_p1, %s432_s11, %s25_s16  }
   0xb   : > { %p494_p5 = por %p33_p2, %p32_p0  ;;  %p498_p6 = por %p39_p4, %p38_p3 }
   0xc   : > { %p83_p7 = scmp.eq.s32.totalorder %s476_s13, 1  ;;  %p89_p8 = scmp.eq.s32.totalorder %s278_s14, 1 }
   0xd   : > { %p302_p10 = scmp.lt.s32.totalorder %s436_s12, 2  ;;  %s112_s23 = sand.u32 1, %s432_s11  }
   0xe   : > { %p505_p11 = por %p83_p7, %p32_p0  ;;  %p509_p12 = por %p89_p8, %p38_p3 }
   0xf   : > { %s282_s24 = sshll.u32 %s436_s12, 7  ;;  %s281_s25 = sshll.u32 %s112_s23, 3 }
  0x10   : > { %s632_s21 = scalar_select %p505_p11, 1, 0 }
  0x11   : > { %s633_s22 = scalar_select %p509_p12, 1, 0 }
  0x12   : > { %s518_s28 = scalar_lea.hbm %s626_s0, %s282_s24  ;;  %s116_s29 = scalar_lea.vmem [#allocation2], %s281_s25 }
  0x13   : > { %s123_s30 = sshll.u32 %s116_s29, 4  ;;  %p522_p13 = pnand %p302_p10, %p494_p5  ;;  %s526_s30 = int_to_ptr.vmem [resolvable:$true] %s123_s30 }
  0x14   : > { %s113_s4 = scalar_lea.sflag [#allocation3], %s112_s23  ;;  %s340_s5 = scalar_lea.hbm %s518_s28, 128 }
  0x15   : > { %p341_p2 = scmp.ne.s32.totalorder %s518_s28, %s340_s5  ;;  %p342_p3 = pneg %p522_p13 }
  0x16   : > { %s345_s8 = scalar_lea.hbm %s626_s0, 256  ;;  %p346_p5 = scmp.lt.u32.totalorder %s518_s28, %s626_s0 }
  0x17   : > { %p343_p4 = pnand %p342_p3, %p341_p2  ;;  %p347_p8 = scmp.lt.u32.totalorder %s345_s8, %s340_s5 }
  0x18   : > { %p349_p9 = scmp.lt.u32.totalorder %s340_s5, %s518_s28 }
  0x19   : > { %p344_p7 = pneg %p343_p4  ;;  %p348_p10 = por %p347_p8, %p346_p5 }
  0x1b   : > { %p350_p0 = por %p349_p9, %p348_p10 }
  0x1d   : > { %p351_p1 = pnand %p350_p0, %p344_p7 }
  0x1f   : > { %354 = shalt.err (!%p351_p1)
}
  0x20   : > { %s355_s17 = scalar_lea.vmem %s526_s30, 128  ;;  %s438_s19 = smov [#allocation2]  }
  0x21   : > { %p356_p2 = scmp.ne.s32.totalorder %s526_s30, %s355_s17  ;;  %s360_s23 = sshll.u32 %s438_s19, 4  ;;  %s361_s23 = int_to_ptr.vmem [resolvable:$false] %s360_s23 }
  0x22   : > { %s362_s24 = scalar_lea.vmem %s361_s23, 256  ;;  %p363_p11 = scmp.lt.s32.totalorder %s526_s30, %s361_s23 }
  0x23   : > { %p358_p4 = pnand %p356_p2, %p342_p3  ;;  %p364_p5 = scmp.lt.s32.totalorder %s362_s24, %s355_s17 }
  0x25   : > { %p359_p12 = pneg %p358_p4  ;;  %p365_p8 = por %p364_p5, %p363_p11 }
  0x27   : > { %p366_p9 = pnand %p365_p8, %p359_p12 }
  0x29   : > { %369 = shalt.err (!%p366_p9)
}
  0x2a   : > { %297 = dma.hbm_to_vmem [thread:$0]  (!%p522_p13), %s518_s28, 128, %s526_s30, %s113_s4  }
  0x2b   : > { %p635_p0 = scmp.lt.s32.totalorder %s436_s12, 3  ;;  %p636_p1 = scmp.ge.s32.totalorder %s436_s12, 1 }
  0x2d   : > { %p129_p3 = pnand %p636_p1, %p635_p0 }
  0x2e   : > { %s560_s25 = sand.u32 (!%p129_p3), 1, %s428_s10  }
  0x2f   : > { %132 = sbr.rel (%p129_p3) target bundleno = 398 (0x18e), region = 28  ;;  %s284_s26 = sshll.u32 (!%p129_p3), %s560_s25, 3 }
  0x30   : > { %s135_s27 = scalar_lea.sflag (!%p129_p3), [#allocation3], %s560_s25  ;;  %s138_s29 = scalar_lea.vmem (!%p129_p3), [#allocation2], %s284_s26 }
  0x36   : > { %415 = dma.done.wait (%p498_p6), %s135_s27, 128  }
  0x37   : > { %417 = vsyncadd (%p498_p6), %s135_s27, 4294967168  ;;  %vm160_vm0 = vcmask 261120   ;;  %v159_v0 = vld [vmem:[%s138_s29] sm:$0xff]  ;;  %v182_v12 = vlaneseq  ;;  %s287_s30 = sshll.u32 %s476_s13, 7  ;;  %s158_s3 = scalar_lea.vmem [#allocation5], %s284_s26 }
  0x38   : > { %v161_v1 = vsel %vm160_vm0, %v159_v0, 0.0  ;;  %v181_v18 = vld [vmem:[%s627_s1] sm:$0x3]  ;;  %s208_s4 = sshll.u32 %s158_s3, 4  ;;  %s581_s7 = scalar_lea.hbm %s628_s2, %s287_s30  ;;  %s583_s4 = int_to_ptr.vmem [resolvable:$true] %s208_s4 }
  0x39   : > { %162 = vadd.xlane.f32.xlu0 %v161_v1  ;;  %v183_v16 = vshrl.u32 %v182_v12, 7  ;;  %s195_s8 = scalar_lea.sflag [#allocation4], %s560_s25  ;;  %s370_s14 = scalar_lea.vmem %s583_s4, 128 }
  0x3a   : > { %p371_p6 = scmp.ne.s32.totalorder %s583_s4, %s370_s14  ;;  %p637_p11 = scmp.ne.s32.totalorder %s632_s21, 0 }
  0x3b   : > { %v184_v17 = vsub.s32 0, %v183_v16  ;;  %v190_v20 = vsub.s32 1, %v183_v16  ;;  %s439_s13 = smov [#allocation5]  }
  0x3c   : > { %p372_p12 = pnand %p371_p6, %p637_p11  ;;  %s374_s16 = sshll.u32 %s439_s13, 4  ;;  %s375_s16 = int_to_ptr.vmem [resolvable:$false] %s374_s16 }
  0x3d   : > { %v185_v19 = vrot.slane %v181_v18, %v184_v17  ;;  %v191_v23 = vrot.slane %v181_v18, %v190_v20  ;;  %s376_s17 = scalar_lea.vmem %s375_s16, 256  ;;  %p377_p7 = scmp.lt.s32.totalorder %s583_s4, %s375_s16 }
  0x3e   : > { %p373_p13 = pneg %p372_p12  ;;  %p378_p10 = scmp.lt.s32.totalorder %s376_s17, %s370_s14 }
  0x40   : > { %p379_p2 = por %p378_p10, %p377_p7 }
  0x42   : > { %p380_p4 = pnand %p379_p2, %p373_p13 }
  0xc6   : > { %v163_v2 = vpop.xlane.xlu0 %162 }
  0xc7   : > { %v164_v3 = vmul.f32 0.03125, %v163_v2 }
  0xc9   : > { %v165_v4 = vsub.f32 %v159_v0, %v164_v3 }
  0xcb   : > { %v166_v5 = vmul.f32 %v165_v4, %v165_v4 }
  0xcd   : > { %v167_v6 = vsel %vm160_vm0, %v166_v5, 0.0 }
  0xce   : > { %168 = vadd.xlane.f32.xlu0 %v167_v6 }
 0x15b   : > { %v169_v7 = vpop.xlane.xlu0 %168 }
 0x15c   : > { %v170_v8 = vmul.f32 0.032258064, %v169_v7 }
 0x15e   : > { %336 = vrsqrt.f32 %v170_v8  ;;  %vm173_vm1 = vcmp.eq.f32.partialorder %v170_v8, inf  ;;  %v176_v11 = vand.u32 2147483648, %v170_v8  ;;  %vm175_vm2 = vcmp.eq.f32.partialorder %v170_v8, 0.0 }
 0x168   : > { %v337_v9 = vpop.eup %336 }
 0x169   : > { %v172_v10 = vmul.f32 %v337_v9, %v170_v8 }
 0x16b   : > { %v174_v13 = vsel %vm173_vm1, %v170_v8, %v172_v10 }
 0x16c   : > { %v177_v14 = vsel %vm175_vm2, %v176_v11, %v174_v13 }
 0x16d   : > { %v178_v15 = vadd.f32 1e-06, %v177_v14 }
 0x16f   : > { %338 = vrcp.f32 %v178_v15 }
 0x179   : > { %v339_v21 = vpop.eup %338 }
 0x17a   : > { %v186_v22 = vmul.f32 %v339_v21, %v185_v19 }
 0x17c   : > { %v187_v24 = vmul.f32 %v186_v22, %v165_v4 }
 0x17e   : > { %v192_v25 = vadd.f32 %v191_v23, %v187_v24 }
 0x180   : > { %193 = vst.msk [vmem:[%s158_s3] sm:$0xff] %vm160_vm0, %v192_v25 }
 0x181   : > { %383 = shalt.err (!%p380_p4)
}
 0x182   : > { %s384_s19 = scalar_lea.hbm %s581_s7, 128  ;;  %s388_s25 = scalar_lea.hbm %s628_s2, 256 }
 0x183   : > { %p385_p5 = scmp.ne.s32.totalorder %s581_s7, %s384_s19  ;;  %p389_p0 = scmp.lt.u32.totalorder %s581_s7, %s628_s2 }
 0x184   : > { %p390_p1 = scmp.lt.u32.totalorder %s388_s25, %s384_s19  ;;  %p392_p6 = scmp.lt.u32.totalorder %s384_s19, %s581_s7 }
 0x185   : > { %p386_p8 = pnand %p385_p5, %p637_p11 }
 0x186   : > { %p391_p3 = por %p390_p1, %p389_p0 }
 0x187   : > { %p387_p9 = pneg %p386_p8 }
 0x188   : > { %p393_p12 = por %p392_p6, %p391_p3 }
 0x18a   : > { %p394_p13 = pnand %p393_p12, %p387_p9 }
 0x18c   : > { %397 = shalt.err (!%p394_p13)
}
 0x18d   : > { %292 = dma.vmem_to_hbm [thread:$0]  (%p637_p11), %s583_s4, 128, %s581_s7, %s195_s8  }
 0x18e PF: > { %s220_s29 = sand.u32 1, %s424_s9   ;;  %p638_p7 = scmp.ne.s32.totalorder %s633_s22, 0 }
 0x18f   : > { %p639_p10 = scmp.ge.s32.totalorder %s436_s12, 2  ;;  %s221_s20 = scalar_lea.sflag [#allocation4], %s220_s29 }
 0x191   : > { %p299_p2 = pnand %p639_p10, %p638_p7 }
 0x193   : > { %419 = dma.done.wait (!%p299_p2), %s221_s20, 128  }
 0x194   : > { %421 = vsyncadd (!%p299_p2), %s221_s20, 4294967168  ;;  %p15_p4 = scmp.ge.s32.totalorder %s480_s15, 4   ;;  %s640_s9 = smov %s428_s10 }
 0x195   : > { %s641_s10 = smov %s432_s11  ;;  %s642_s11 = smov %s492_s18 }
 0x196   : > { %s643_s12 = smov %s480_s15  ;;  %17 = sbr.rel (!%p15_p4) target bundleno = 5 (0x5), region = 73 }
 0x19d   :  { %226 = vsyncpa [#allocation3], 1 }
 0x19e   :  { %228 = vsyncpa [#allocation3 + $0x1], 1 }
 0x19f   :  { %229 = vsyncpa [#allocation4], 1 }
 0x1a0   :  { %231 = vsyncpa [#allocation4 + $0x1], 1 }

</bundles_post_ra>
